<compile_context>
chip_gen: v7x
topology: tpu7x:2x2x1
jax: 0.10.0
libtpu: 0.0.40
codegen_flags: <defaults>
</compile_context>

<pallas_src>
import jax
import jax.numpy as jnp
from jax.experimental import pallas as pl
from jax.experimental.pallas import tpu as pltpu


def _per_row_focal(x_f32, tgt_i32, alpha, gamma):
    """x_f32: (T, C) f32 logits; tgt_i32: (T, 1) int32 -> (T, 1) f32 focal loss."""
    # Numerically stable log-softmax cross entropy (matches F.cross_entropy).
    m = jnp.max(x_f32, axis=-1, keepdims=True)                                # (T, 1)
    lse = m + jnp.log(jnp.sum(jnp.exp(x_f32 - m), axis=-1, keepdims=True))    # (T, 1)

    # Gather logit at the target class via a one-hot lane mask.
    col = jax.lax.broadcasted_iota(jnp.int32, x_f32.shape, 1)                 # (T, C)
    x_t = jnp.sum(jnp.where(col == tgt_i32, x_f32, 0.0), axis=-1, keepdims=True)

    # Clamp: ce is mathematically >= 0 but rounding can make it slightly
    # negative, which would make (1 - pt) negative and pow() produce NaN.
    ce = jnp.maximum(lse - x_t, 0.0)                                          # (T, 1)
    pt = jnp.exp(-ce)
    w = 1.0 - pt

    g = float(gamma)
    if g == 2.0:          # default: keep it on the 4-wide VALU, no EUP pow
        mod = w * w
    elif g == 1.0:
        mod = w
    elif g == 0.0:
        mod = jnp.ones_like(w)
    else:
        mod = jnp.maximum(w, 0.0) ** g
    return alpha * mod * ce


def _focal_reduce_kernel(alpha, gamma, n_rows, tile_n, scale):
    """Accumulating kernel for reduction in {'mean', 'sum'} (scale = 1/N or 1)."""

    def kernel(logits_ref, tgt_ref, out_ref):
        i = pl.program_id(0)

        @pl.when(i == 0)
        def _init():
            out_ref[...] = jnp.zeros_like(out_ref)

        focal = _per_row_focal(
            logits_ref[...].astype(jnp.float32), tgt_ref[...], alpha, gamma)

        # Mask padded rows of a partial last tile so they don't pollute the sum.
        row = i * tile_n + jax.lax.broadcasted_iota(jnp.int32, focal.shape, 0)
        focal = jnp.where(row < n_rows, focal, 0.0)

        out_ref[...] += jnp.sum(focal).reshape(1, 1)

        @pl.when(i == pl.num_programs(0) - 1)
        def _finalize():
            out_ref[...] = out_ref[...] * scale

    return kernel


def _focal_elementwise_kernel(alpha, gamma):
    """Per-row kernel for reduction='none'."""

    def kernel(logits_ref, tgt_ref, out_ref):
        out_ref[...] = _per_row_focal(
            logits_ref[...].astype(jnp.float32), tgt_ref[...], alpha, gamma)

    return kernel


def focal_loss(predictions: jax.Array,
               targets: jax.Array,
               alpha: float = 1.0,
               gamma: float = 2.0,
               reduction: str = "mean") -> jax.Array:
    """predictions: (N, C) float logits (any float dtype); targets: (N,) int ids.

    Matches the PyTorch FocalLoss forward: reduction in {'mean', 'sum', 'none'}.
    """
    n, c = predictions.shape
    targets_2d = targets.astype(jnp.int32).reshape(n, 1)

    # ---- tile-size selection (generation-safe) -------------------------------
    itemsize = jnp.dtype(predictions.dtype).itemsize
    # Per-block VMEM footprint estimate: lanes pad to 128.
    row_bytes = max(c, 128) * max(itemsize, 2)
    tile_n = max(8, ((4 << 20) // row_bytes) // 8 * 8)   # ~4 MiB logits block
    tile_n = min(tile_n, 2048)
    if tile_n >= n:
        tile_n = n            # single full-extent block is always a legal shape
    num_tiles = pl.cdiv(n, tile_n)

    in_specs = [
        pl.BlockSpec((tile_n, c), lambda i: (i, 0)),
        pl.BlockSpec((tile_n, 1), lambda i: (i, 0)),
    ]
    cost = pl.CostEstimate(
        flops=8 * n * c,
        transcendentals=n * (c + 2),
        bytes_accessed=n * c * itemsize + n * 4 + 4,
    )

    if reduction in ("mean", "sum"):
        scale = (1.0 / n) if reduction == "mean" else 1.0
        out = pl.pallas_call(
            _focal_reduce_kernel(float(alpha), float(gamma), n, tile_n, scale),
            out_shape=jax.ShapeDtypeStruct((1, 1), jnp.float32),
            grid=(num_tiles,),
            in_specs=in_specs,
            # Same (1,1) block every step -> resident accumulator across the grid.
            out_specs=pl.BlockSpec((1, 1), lambda i: (0, 0)),
            compiler_params=pltpu.CompilerParams(
                dimension_semantics=("arbitrary",),
                vmem_limit_bytes=32 * 1024 * 1024,
            ),
            cost_estimate=cost,
        )(predictions, targets_2d)
        return out[0, 0]

    if reduction == "none":
        out = pl.pallas_call(
            _focal_elementwise_kernel(float(alpha), float(gamma)),
            out_shape=jax.ShapeDtypeStruct((n, 1), jnp.float32),
            grid=(num_tiles,),
            in_specs=in_specs,
            out_specs=pl.BlockSpec((tile_n, 1), lambda i: (i, 0)),
            compiler_params=pltpu.CompilerParams(
                dimension_semantics=("parallel",),
                vmem_limit_bytes=32 * 1024 * 1024,
            ),
            cost_estimate=cost,
        )(predictions, targets_2d)
        return out[:, 0]

    raise ValueError(f"unknown reduction: {reduction!r}")


# ------------------------------- validation ----------------------------------
def _focal_loss_ref(predictions, targets, alpha=1.0, gamma=2.0, reduction="mean"):
    logp = jax.nn.log_softmax(predictions.astype(jnp.float32), axis=-1)
    ce = -jnp.take_along_axis(logp, targets[:, None].astype(jnp.int32), axis=-1)[:, 0]
    pt = jnp.exp(-ce)
    fl = alpha * (1.0 - pt) ** gamma * ce
    if reduction == "mean":
        return jnp.mean(fl)
    if reduction == "sum":
        return jnp.sum(fl)
    return fl


if __name__ == "__main__":
    key = jax.random.PRNGKey(0)
    k1, k2 = jax.random.split(key)

    N, C = 8, 16
    predictions = jax.random.normal(k1, (N, C), dtype=jnp.float32)
    targets = jax.random.randint(k2, (N,), 0, C, dtype=jnp.int32)

    # mean reduction (module default)
    loss = focal_loss(predictions, targets, alpha=1.0, gamma=2.0, reduction="mean")
    jax.block_until_ready(loss)
    ref = _focal_loss_ref(predictions, targets, 1.0, 2.0, "mean")
    assert jnp.allclose(loss, ref, atol=1e-5, rtol=1e-5), (loss, ref)

    # 'none' reduction (per-row)
    loss_none = focal_loss(predictions, targets, alpha=1.0, gamma=2.0, reduction="none")
    jax.block_until_ready(loss_none)
    ref_none = _focal_loss_ref(predictions, targets, 1.0, 2.0, "none")
    assert jnp.allclose(loss_none, ref_none, atol=1e-5, rtol=1e-5)

    # bf16-on-the-wire path (kernel upcasts internally)
    pred_bf16 = predictions.astype(jnp.bfloat16)
    loss_bf16 = focal_loss(pred_bf16, targets, alpha=1.0, gamma=2.0, reduction="mean")
    jax.block_until_ready(loss_bf16)
    ref_bf16 = _focal_loss_ref(pred_bf16, targets, 1.0, 2.0, "mean")
    assert jnp.allclose(loss_bf16, ref_bf16, atol=1e-3, rtol=1e-3), (loss_bf16, ref_bf16)

    print("KERNEL_OK")
</pallas_src>

<mosaic_0001>
module attributes {stable_mosaic.version = 11 : i64} {
  func.func @kernel(%arg0: i32, %arg1: memref<8x16xf32, #tpu.memory_space<vmem>>, %arg2: memref<8x1xi32, #tpu.memory_space<vmem>>, %arg3: memref<1x1xf32, #tpu.memory_space<vmem>>) attributes {dimension_semantics = [#tpu.dimension_semantics<arbitrary>], iteration_bounds = array<i64: 1>, scalar_prefetch = 0 : i64, scratch_operands = 0 : i64, tpu.core_type = #tpu.core_type<tc>, window_params = [{transform_indices = @transform_0, window_bounds = array<i64: 8, 16>}, {transform_indices = @transform_1, window_bounds = array<i64: 8, 1>}, {pipeline_mode = #tpu.pipeline_mode<synchronous>, transform_indices = @transform_2, window_bounds = array<i64: 1, 1>}]} {
    %c0_i32 = arith.constant 0 : i32
    %0 = arith.cmpi eq, %arg0, %c0_i32 : i32
    %1 = arith.extui %0 : i1 to i32
    %c0_i32_0 = arith.constant 0 : i32
    %2 = arith.cmpi ne, %1, %c0_i32_0 : i32
    scf.if %2 {
      %cst_20 = arith.constant 0.000000e+00 : f32
      %52 = vector.broadcast %cst_20 : f32 to vector<1x1xf32>
      %c0_21 = arith.constant 0 : index
      %c0_22 = arith.constant 0 : index
      %53 = vector.load %arg3[%c0_21, %c0_22] : memref<1x1xf32, #tpu.memory_space<vmem>>, vector<1x1xf32>
      tpu.vector_store %arg3[%c0_21, %c0_22], %52 {strides = array<i32>} : memref<1x1xf32, #tpu.memory_space<vmem>>, vector<1x1xf32>,
    } else {
    }
    %c0 = arith.constant 0 : index
    %c0_1 = arith.constant 0 : index
    %3 = vector.load %arg1[%c0, %c0_1] : memref<8x16xf32, #tpu.memory_space<vmem>>, vector<8x16xf32>
    %c0_2 = arith.constant 0 : index
    %c0_3 = arith.constant 0 : index
    %4 = vector.load %arg2[%c0_2, %c0_3] : memref<8x1xi32, #tpu.memory_space<vmem>>, vector<8x1xi32>
    %cst = arith.constant dense<0xFF800000> : vector<8xf32>
    %5 = vector.multi_reduction <maximumf>, %3, %cst [1] : vector<8x16xf32> to vector<8xf32>
    %6 = vector.shape_cast %5 : vector<8xf32> to vector<8x1xf32>
    %7 = vector.broadcast %6 : vector<8x1xf32> to vector<8x16xf32>
    %8 = arith.subf %3, %7 : vector<8x16xf32>
    %9 = math.exp %8 : vector<8x16xf32>
    %cst_4 = arith.constant dense<0.000000e+00> : vector<8xf32>
    %10 = vector.multi_reduction <add>, %9, %cst_4 [1] : vector<8x16xf32> to vector<8xf32>
    %11 = vector.shape_cast %10 : vector<8xf32> to vector<8x1xf32>
    %12 = math.log %11 : vector<8x1xf32>
    %13 = arith.addf %6, %12 : vector<8x1xf32>
    %14 = tpu.iota {dimensions = array<i32: 1>} : vector<8x16xi32>
    %15 = vector.broadcast %4 : vector<8x1xi32> to vector<8x16xi32>
    %16 = arith.cmpi eq, %14, %15 : vector<8x16xi32>
    %cst_5 = arith.constant 0.000000e+00 : f32
    %17 = vector.broadcast %cst_5 : f32 to vector<8x16xf32>
    %18 = arith.select %16, %3, %17 : vector<8x16xi1>, vector<8x16xf32>
    %cst_6 = arith.constant dense<0.000000e+00> : vector<8xf32>
    %19 = vector.multi_reduction <add>, %18, %cst_6 [1] : vector<8x16xf32> to vector<8xf32>
    %20 = vector.shape_cast %19 : vector<8xf32> to vector<8x1xf32>
    %21 = arith.subf %13, %20 : vector<8x1xf32>
    %cst_7 = arith.constant 0.000000e+00 : f32
    %22 = vector.broadcast %cst_7 : f32 to vector<8x1xf32>
    %23 = arith.maximumf %21, %22 : vector<8x1xf32>
    %cst_8 = arith.constant 0.000000e+00 : f32
    %24 = vector.broadcast %cst_8 : f32 to vector<8x1xf32>
    %25 = arith.subf %24, %23 : vector<8x1xf32>
    %26 = math.exp %25 : vector<8x1xf32>
    %cst_9 = arith.constant 1.000000e+00 : f32
    %27 = vector.broadcast %cst_9 : f32 to vector<8x1xf32>
    %28 = arith.subf %27, %26 : vector<8x1xf32>
    %29 = arith.mulf %28, %28 : vector<8x1xf32>
    %cst_10 = arith.constant 1.000000e+00 : f32
    %30 = vector.broadcast %cst_10 : f32 to vector<8x1xf32>
    %31 = arith.mulf %30, %29 : vector<8x1xf32>
    %32 = arith.mulf %31, %23 : vector<8x1xf32>
    %c8_i32 = arith.constant 8 : i32
    %33 = arith.muli %arg0, %c8_i32 : i32
    %34 = tpu.iota {dimensions = array<i32: 0>} : vector<8x1xi32>
    %35 = vector.broadcast %33 : i32 to vector<8x1xi32>
    %36 = arith.addi %35, %34 : vector<8x1xi32>
    %c8_i32_11 = arith.constant 8 : i32
    %37 = vector.broadcast %c8_i32_11 : i32 to vector<8x1xi32>
    %38 = arith.cmpi slt, %36, %37 : vector<8x1xi32>
    %cst_12 = arith.constant 0.000000e+00 : f32
    %39 = vector.broadcast %cst_12 : f32 to vector<8x1xf32>
    %40 = arith.select %38, %32, %39 : vector<8x1xi1>, vector<8x1xf32>
    %c0_13 = arith.constant 0 : index
    %c0_14 = arith.constant 0 : index
    %41 = vector.load %arg3[%c0_13, %c0_14] : memref<1x1xf32, #tpu.memory_space<vmem>>, vector<1x1xf32>
    %42 = vector.shape_cast %40 : vector<8x1xf32> to vector<1x8x1xf32>
    %cst_15 = arith.constant dense<0.000000e+00> : vector<1xf32>
    %43 = vector.multi_reduction <add>, %42, %cst_15 [1, 2] : vector<1x8x1xf32> to vector<1xf32>
    %44 = vector.shape_cast %43 : vector<1xf32> to vector<1x1x1xf32>
    %45 = vector.extract %44[0, 0, 0] : f32 from vector<1x1x1xf32>
    %46 = vector.broadcast %45 : f32 to vector<1x1xf32>
    %47 = arith.addf %41, %46 : vector<1x1xf32>
    %c0_16 = arith.constant 0 : index
    %c0_17 = arith.constant 0 : index
    %48 = vector.load %arg3[%c0_16, %c0_17] : memref<1x1xf32, #tpu.memory_space<vmem>>, vector<1x1xf32>
    tpu.vector_store %arg3[%c0_16, %c0_17], %47 {strides = array<i32>} : memref<1x1xf32, #tpu.memory_space<vmem>>, vector<1x1xf32>,
    %c0_i32_18 = arith.constant 0 : i32
    %49 = arith.cmpi eq, %arg0, %c0_i32_18 : i32
    %50 = arith.extui %49 : i1 to i32
    %c0_i32_19 = arith.constant 0 : i32
    %51 = arith.cmpi ne, %50, %c0_i32_19 : i32
    scf.if %51 {
      %c0_20 = arith.constant 0 : index
      %c0_21 = arith.constant 0 : index
      %52 = vector.load %arg3[%c0_20, %c0_21] : memref<1x1xf32, #tpu.memory_space<vmem>>, vector<1x1xf32>
      %cst_22 = arith.constant 1.250000e-01 : f32
      %53 = vector.broadcast %cst_22 : f32 to vector<1x1xf32>
      %54 = arith.mulf %52, %53 : vector<1x1xf32>
      %c0_23 = arith.constant 0 : index
      %c0_24 = arith.constant 0 : index
      %55 = vector.load %arg3[%c0_23, %c0_24] : memref<1x1xf32, #tpu.memory_space<vmem>>, vector<1x1xf32>
      tpu.vector_store %arg3[%c0_23, %c0_24], %54 {strides = array<i32>} : memref<1x1xf32, #tpu.memory_space<vmem>>, vector<1x1xf32>,
    } else {
    }
    return
  }
  func.func @transform_0(%arg0: i32) -> (i32, i32) {
    %c0_i32 = arith.constant 0 : i32
    %c0_i32_0 = arith.constant 0 : i32
    return %arg0, %c0_i32 : i32, i32
  }
  func.func @transform_1(%arg0: i32) -> (i32, i32) {
    %c0_i32 = arith.constant 0 : i32
    %c0_i32_0 = arith.constant 0 : i32
    return %arg0, %c0_i32 : i32, i32
  }
  func.func @transform_2(%arg0: i32) -> (i32, i32) {
    %c0_i32 = arith.constant 0 : i32
    %c0_i32_0 = arith.constant 0 : i32
    %c0_i32_1 = arith.constant 0 : i32
    return %c0_i32, %c0_i32_0 : i32, i32
  }
}

</mosaic_0001>

<bundles_post_ra>
// kernel: tpu_custom_call.1
= control target key start
LH: loop header
LB: loop body
LE: loop exit
PB: predicated region body
PF: predicated region fallthrough
CT: control target
= control target key end

     0   :  { %vm20_vm0 = vcmask 130048   ;;  %s172_s0 = inlined_call_operand.vmem [shape: f32[8,16], index: 0, kind: input, shape index: {}]   ;;  %s173_s1 = inlined_call_operand.vmem [shape: s32[8,1], index: 1, kind: input, shape index: {}]   ;;  %s174_s2 = inlined_call_operand.hbm [shape: f32[1,1], index: 2, kind: output, shape index: {}]  }
   0x1   :  { %v18_v0 = vld [vmem:[%s172_s0] sm:$0xff] }
   0x2   :  { %7 = vsyncpa [#allocation3], 0  ;;  %v21_v1 = vsel %vm20_vm0, %v18_v0, -inf  ;;  %v130_v2 = vmov 0   ;;  %v19_v3 = vld [vmem:[%s173_s1] sm:$0xff]  ;;  %v33_v7 = vlaneseq  ;;  %vm59_vm2 = vcmask 7168  }
   0x3   :  { %99 = vset.pattern.permute.xlu0 %v130_v2  ;;  %vm16_vm3 = vcmask 0   ;;  %v131_v28 = vmov 0.0   ;;  %s132_s1 = smov [#allocation2]  }
   0x4   :  { %22 = vmax.xlane.f32.xlu0 %v21_v1  ;;  %v34_v8 = vand.u32 127, %v33_v7  ;;  %17 = vst.msk [vmem:[#allocation2] sm:$0x1] %vm16_vm3, %v131_v28  ;;  %s86_s13 = sshll.u32 %s132_s1, 4  ;;  %s87_s13 = int_to_ptr.vmem [resolvable:$true] %s86_s13 }
   0x5   :  { %s106_s14 = scalar_lea.vmem %s87_s13, 16  ;;  %s110_s15 = scalar_lea.vmem %s87_s13, 32 }
   0x6   :  { %p107_p0 = scmp.ne.s32.totalorder %s87_s13, %s106_s14  ;;  %p111_p1 = scmp.lt.s32.totalorder %s87_s13, %s87_s13 }
   0x7   :  { %p112_p2 = scmp.lt.s32.totalorder %s110_s15, %s106_s14 }
   0x9   :  { %p113_p3 = por %p112_p2, %p111_p1 }
   0xb   :  { %v58_v36 = vld [vmem:[#allocation2] sm:$0x1]  ;;  %p114_p4 = pnand %p113_p3, %p107_p0 }
  0x1a   :  { %36 = vperm.xlu0 %99, %v19_v3  }
  0x91   :  { %v23_v4 = vpop.xlane.xlu0 %22 }
  0x92   :  { %v24_v5 = vsub.f32 %v18_v0, %v23_v4 }
  0x94   :  { %v25_v6 = vmul.f32 1.442695, %v24_v5 }
  0x96   :  { %100 = vpow2.f32 %v25_v6 }
  0x99   :  { %v37_v9 = vpop.permute.xlu0 %36 }
  0x9a   :  { %vm38_vm1 = vcmp.eq.s32.totalorder %v34_v8, %v37_v9 }
  0x9b   :  { %v39_v11 = vsel %vm38_vm1, %v18_v0, 0.0 }
  0x9c   :  { %v40_v13 = vsel %vm20_vm0, %v39_v11, 0.0 }
  0xa0   :  { %v101_v10 = vpop.eup %100 }
  0xa1   :  { %v27_v12 = vsel %vm20_vm0, %v101_v10, 0.0 }
  0xa2   :  { %28 = vadd.xlane.f32.xlu1 %v27_v12 }
  0xa6   :  { %41 = vadd.xlane.f32.xlu1 %v40_v13 }
 0x12f   :  { %v29_v14 = vpop.xlane.xlu1 %28 }
 0x130   :  { %102 = vlog2.f32 %v29_v14 }
 0x133   :  { %v42_v17 = vpop.xlane.xlu1 %41 }
 0x13a   :  { %v103_v15 = vpop.eup %102 }
 0x13b   :  { %v31_v16 = vmul.f32 0.6931472, %v103_v15 }
 0x13d   :  { %v32_v18 = vadd.f32 %v31_v16, %v23_v4 }
 0x13f   :  { %v43_v19 = vsub.f32 %v32_v18, %v42_v17 }
 0x141   :  { %v44_v20 = vmax.f32 %v43_v19, 0.0 }
 0x143   :  { %v45_v21 = vsub.f32 0.0, %v44_v20 }
 0x145   :  { %v46_v22 = vmul.f32 1.442695, %v45_v21 }
 0x147   :  { %104 = vpow2.f32 %v46_v22 }
 0x151   :  { %v105_v23 = vpop.eup %104 }
 0x152   :  { %v48_v24 = vsub.f32 1.0, %v105_v23 }
 0x154   :  { %v49_v25 = vmul.f32 %v48_v24, %v48_v24 }
 0x156   :  { %v50_v26 = vmul.f32 %v49_v25, %v44_v20 }
 0x158   :  { %v60_v27 = vsel %vm59_vm2, %v50_v26, 0.0 }
 0x159   :  { %61 = vadd.xlane.f32.xlu1 %v60_v27 }
 0x1e6   :  { %v62_v29 = vpop.xlane.xlu1 %61 }
 0x1e7   :  { %v63_v30 = vrot.slane %v62_v29, 4 }
 0x1e9   :  { %v64_v31 = vadd.f32 %v63_v30, %v62_v29 }
 0x1eb   :  { %v65_v32 = vrot.slane %v64_v31, 2 }
 0x1ed   :  { %v66_v33 = vadd.f32 %v65_v32, %v64_v31 }
 0x1ef   :  { %v67_v34 = vrot.slane %v66_v33, 1 }
 0x1f1   :  { %v68_v35 = vadd.f32 %v67_v34, %v66_v33 }
 0x1f3   :  { %94 = vpush %v68_v35 }
 0x224   :  { %s95_s0 = spop %94 }
 0x225   :  { %v70_v37 = vstv %s95_s0 }
 0x226   :  { %v71_v38 = vadd.f32 %v70_v37, %v58_v36 }
 0x228   :  { %73 = vst.msk [vmem:[#allocation2] sm:$0x1] %vm16_vm3, %v71_v38 }
 0x22f   :  { %v77_v39 = vld [vmem:[#allocation2] sm:$0x1] }
 0x230   :  { %v78_v40 = vmul.f32 0.125, %v77_v39 }
 0x232   :  { %79 = vst.msk [vmem:[#allocation2] sm:$0x1] %vm16_vm3, %v78_v40 }
 0x233   :  { %117 = shalt.err (!%p114_p4)
}
 0x234   :  { %s118_s18 = scalar_lea.hbm %s174_s2, 16 }
 0x235   :  { %p119_p5 = scmp.ne.s32.totalorder %s174_s2, %s118_s18  ;;  %p122_p6 = scmp.lt.u32.totalorder %s118_s18, %s174_s2 }
 0x237   :  { %p124_p7 = pnand %p122_p6, %p119_p5 }
 0x239   :  { %127 = shalt.err (!%p124_p7)
}
 0x23a   :  { %89 = dma.vmem_to_hbm [thread:$0]  %s87_s13, 16, %s174_s2, [#allocation3]  }
 0x23b   :  { %128 = dma.done.wait [#allocation3], 16  }
 0x23c   :  { %129 = vsyncadd [#allocation3], 4294967280 }
 0x23d   :  { %93 = vsyncpa [#allocation3], 1 }

</bundles_post_ra>
